<compile_context>
chip_gen: v5e
topology: v5e:2x2
jax: 0.10.0
libtpu: 0.0.40
codegen_flags: <defaults>
</compile_context>

<pallas_src>
import numpy as np
import jax
import jax.numpy as jnp
from jax.experimental import pallas as pl
from jax.experimental.pallas import tpu as pltpu


def _round_up(x, m):
    return ((x + m - 1) // m) * m


# ----------------------------------------------------------------------------
# Fused kernel (one grid step = one TM-row batch tile):
#   h      = relu(x @ W1' + b1')            (QuatLinear + folded BN + ReLU)
#   f      = relu(h @ W2' + b2')            (QuatLinear + folded BN + ReLU)
#   logits = f @ W_hat^T                    (SLR cosine; normalized W hoisted)
#   out    = [ f | logits ]                 (single lane-dense output slab)
# ----------------------------------------------------------------------------
def _dfn_fused_kernel(x_ref, w1_ref, bias_ref, w2_ref, w3t_ref, out_ref):
    hp = w1_ref.shape[1]     # hidden dim, padded to multiple of 128
    dbp = w2_ref.shape[1]    # bottleneck dim, padded to multiple of 128

    x = x_ref[...]                                                     # (TM, Din) bf16

    # Layer 1: quaternion linear + folded BN + ReLU (f32 accumulate / epilogue)
    h = jnp.dot(x, w1_ref[...], preferred_element_type=jnp.float32)    # (TM, HP)
    h = jnp.maximum(h + bias_ref[0:1, :hp], 0.0)

    # Layer 2 (bottleneck): quaternion linear + folded BN + ReLU
    f = jnp.dot(h.astype(w2_ref.dtype), w2_ref[...],
                preferred_element_type=jnp.float32)                    # (TM, DBP)
    f = jnp.maximum(f + bias_ref[1:2, :dbp], 0.0)

    # SLR cosine (row-normalized, pre-transposed weight)
    logits = jnp.dot(f.astype(w3t_ref.dtype), w3t_ref[...],
                     preferred_element_type=jnp.float32)               # (TM, CP)

    # Single lane-dense output slab: [feats | logits], both 128-aligned writes.
    out_ref[:, :dbp] = f
    out_ref[:, dbp:] = logits


def dfn_forward(x, params):
    n, din = x.shape
    w1, w2, w3t = params["w1"], params["w2"], params["w3t"]
    bias_pack = params["bias_pack"]
    hp, dbp, cp = w1.shape[1], w2.shape[1], w3t.shape[1]
    db, c = params["bottleneck_dim"], params["class_num"]

    # Batch tile: multiple of 16 (bf16 sublane packing), capped for VMEM.
    tm = min(512, _round_up(n, 16))
    n_pad = _round_up(n, tm)
    if n_pad != n:
        x = jnp.pad(x, ((0, n_pad - n), (0, 0)))
    x = x.astype(jnp.bfloat16)

    out_w = dbp + cp
    flops = 2 * n_pad * (din * hp + hp * dbp + dbp * cp)
    bytes_accessed = int(n_pad * din * 2 + din * hp * 2 + bias_pack.size * 4
                         + hp * dbp * 2 + dbp * cp * 2 + n_pad * out_w * 4)

    slab = pl.pallas_call(
        _dfn_fused_kernel,
        out_shape=jax.ShapeDtypeStruct((n_pad, out_w), jnp.float32),
        grid=(n_pad // tm,),
        in_specs=[
            pl.BlockSpec((tm, din), lambda i: (i, 0)),          # x tile
            pl.BlockSpec((din, hp), lambda i: (0, 0)),          # W1' (resident)
            pl.BlockSpec(bias_pack.shape, lambda i: (0, 0)),    # packed biases
            pl.BlockSpec((hp, dbp), lambda i: (0, 0)),          # W2' (resident)
            pl.BlockSpec((dbp, cp), lambda i: (0, 0)),          # W_hat^T (resident)
        ],
        out_specs=pl.BlockSpec((tm, out_w), lambda i: (i, 0)),
        compiler_params=pltpu.CompilerParams(
            dimension_semantics=("parallel",)),
        cost_estimate=pl.CostEstimate(
            flops=flops, transcendentals=0, bytes_accessed=bytes_accessed),
    )(x, w1, bias_pack, w2, w3t)

    feats = slab[:n, :db]
    logits = slab[:n, dbp:dbp + c]

    # SLR bias term: r0 = ||feats[0]||  (global row 0, matching
    # input.norm(dim=1).detach()[0]).  tanh(bias) == 0 for the module's
    # default zero-initialized bias, so this is statically skipped then.
    if params["use_r0"]:
        r0 = jnp.sqrt(jnp.sum(feats[0] * feats[0]))
        logits = logits + r0 * params["slr_tanh_b"]
    return feats, logits


# ----------------------------------------------------------------------------
# Parameter construction + folding / padding (deterministic glue code)
# ----------------------------------------------------------------------------
def make_quaternion_weight(key, in_features, out_features):
    """Equivalent dense (in, out) matrix for a Hamilton-product quaternion linear."""
    assert in_features % 4 == 0 and out_features % 4 == 0
    qi, qo = in_features // 4, out_features // 4
    kr, ki, kj, kk = jax.random.split(key, 4)
    limit = (6.0 / (in_features + out_features)) ** 0.5
    r = jax.random.uniform(kr, (qi, qo), jnp.float32, -limit, limit)
    i = jax.random.uniform(ki, (qi, qo), jnp.float32, -limit, limit)
    j = jax.random.uniform(kj, (qi, qo), jnp.float32, -limit, limit)
    k = jax.random.uniform(kk, (qi, qo), jnp.float32, -limit, limit)
    return jnp.block([
        [r, -i, -j, -k],
        [i,  r, -k,  j],
        [j,  k,  r, -i],
        [k, -j,  i,  r],
    ])  # (in_features, out_features)


def xavier_uniform(key, out_features, in_features):
    limit = (6.0 / (in_features + out_features)) ** 0.5
    return jax.random.uniform(key, (out_features, in_features), jnp.float32,
                              -limit, limit)


def bn_fold(num_features, affine, eps=1e-5):
    """Eval-mode BatchNorm1d (running_mean=0, running_var=1) -> (scale, shift)."""
    running_mean = jnp.zeros((1, num_features), jnp.float32)
    running_var = jnp.ones((1, num_features), jnp.float32)
    scale = 1.0 / jnp.sqrt(running_var + eps)
    shift = -running_mean * scale
    if affine:
        gamma = jnp.ones((1, num_features), jnp.float32)
        beta = jnp.zeros((1, num_features), jnp.float32)
        scale = gamma * scale
        shift = gamma * shift + beta
    return scale, shift


def fold_linear_bn(w, b, scale, shift):
    """Fold y = (x@W + b)*scale + shift into y = x@W' + b'."""
    return w * scale, b * scale + shift


def _pad_to(a, rows, cols):
    return jnp.pad(a, ((0, rows - a.shape[0]), (0, cols - a.shape[1])))


def make_params(key, input_size, hidden_size, bottleneck_dim, class_num):
    k1, k2, k3, kb1, kb2 = jax.random.split(key, 5)

    hp = _round_up(hidden_size, 128)
    dbp = _round_up(bottleneck_dim, 128)
    cp = _round_up(class_num, 128)
    bias_w = max(hp, dbp)

    # feature_extractor: QuaternionLinear -> BN(affine=False) -> ReLU -> Dropout -> Flatten
    w1 = make_quaternion_weight(k1, input_size, hidden_size)
    b1 = 0.01 * jax.random.normal(kb1, (1, hidden_size), jnp.float32)
    s1, t1 = bn_fold(hidden_size, affine=False)
    w1_eff, b1_eff = fold_linear_bn(w1, b1, s1, t1)

    # bottleneck: QuaternionLinear -> BN(affine=True) -> ReLU -> Dropout
    w2 = make_quaternion_weight(k2, hidden_size, bottleneck_dim)
    b2 = 0.01 * jax.random.normal(kb2, (1, bottleneck_dim), jnp.float32)
    s2, t2 = bn_fold(bottleneck_dim, affine=True)
    w2_eff, b2_eff = fold_linear_bn(w2, b2, s2, t2)

    # fc: SLR_layer — row-normalize weight, transpose, precompute tanh(bias)
    slr_w = xavier_uniform(k3, class_num, bottleneck_dim)          # (C, DB)
    slr_b_np = np.zeros((1, class_num), np.float32)                # Parameter(torch.zeros(C))
    w_norm = jnp.sqrt(jnp.sum(slr_w * slr_w, axis=1, keepdims=True))
    slr_w_hat_t = (slr_w / jnp.maximum(w_norm, 1e-12)).T           # (DB, C)
    tanh_b_np = np.tanh(slr_b_np)
    use_r0 = bool(np.any(tanh_b_np != 0.0))                        # False for default params

    # Zero-pad feature dims to lane-dense multiples of 128 and cast MXU
    # operands to bf16 (f32 accumulation stays in-kernel).
    w1_p = _pad_to(w1_eff, input_size, hp).astype(jnp.bfloat16)    # (Din, HP)
    w2_p = _pad_to(w2_eff, hp, dbp).astype(jnp.bfloat16)           # (HP, DBP)
    w3t_p = _pad_to(slr_w_hat_t, dbp, cp).astype(jnp.bfloat16)     # (DBP, CP)
    bias_pack = jnp.stack([
        jnp.pad(b1_eff[0], (0, bias_w - hidden_size)),
        jnp.pad(b2_eff[0], (0, bias_w - bottleneck_dim)),
    ]).astype(jnp.float32)                                         # (2, bias_w)

    return {
        "w1": w1_p, "w2": w2_p, "w3t": w3t_p, "bias_pack": bias_pack,
        "slr_tanh_b": jnp.asarray(tanh_b_np),
        "use_r0": use_r0,
        "bottleneck_dim": bottleneck_dim, "class_num": class_num,
    }


if __name__ == "__main__":
    # Small shapes consistent with the module (input/hidden/bottleneck divisible
    # by 4 for the quaternion layers), class_num = 3.
    batch, input_size, hidden_size, bottleneck_dim, class_num = 8, 64, 32, 16, 3

    key = jax.random.PRNGKey(0)
    kx, kp = jax.random.split(key, 2)

    x = jax.random.normal(kx, (batch, input_size), jnp.float32)
    params = make_params(kp, input_size, hidden_size, bottleneck_dim, class_num)

    feats, logits = dfn_forward(x, params)
    jax.block_until_ready((feats, logits))

    assert feats.shape == (batch, bottleneck_dim)
    assert logits.shape == (batch, class_num)
    assert bool(jnp.all(jnp.isfinite(feats))) and bool(jnp.all(jnp.isfinite(logits)))
    print("KERNEL_OK")
</pallas_src>

<mosaic_0001>
module attributes {stable_mosaic.version = 11 : i64} {
  func.func @_dfn_fused_kernel(%arg0: i32, %arg1: memref<16x64xbf16, #tpu.memory_space<vmem>>, %arg2: memref<64x128xbf16, #tpu.memory_space<vmem>>, %arg3: memref<2x128xf32, #tpu.memory_space<vmem>>, %arg4: memref<128x128xbf16, #tpu.memory_space<vmem>>, %arg5: memref<128x128xbf16, #tpu.memory_space<vmem>>, %arg6: memref<16x256xf32, #tpu.memory_space<vmem>>) attributes {dimension_semantics = [#tpu.dimension_semantics<parallel>], iteration_bounds = array<i64: 1>, scalar_prefetch = 0 : i64, scratch_operands = 0 : i64, tpu.core_type = #tpu.core_type<tc>, window_params = [{transform_indices = @transform_0, window_bounds = array<i64: 16, 64>}, {pipeline_mode = #tpu.pipeline_mode<synchronous>, transform_indices = @transform_1, window_bounds = array<i64: 64, 128>}, {pipeline_mode = #tpu.pipeline_mode<synchronous>, transform_indices = @transform_2, window_bounds = array<i64: 2, 128>}, {pipeline_mode = #tpu.pipeline_mode<synchronous>, transform_indices = @transform_3, window_bounds = array<i64: 128, 128>}, {pipeline_mode = #tpu.pipeline_mode<synchronous>, transform_indices = @transform_4, window_bounds = array<i64: 128, 128>}, {transform_indices = @transform_5, window_bounds = array<i64: 16, 256>}]} {
    %c0 = arith.constant 0 : index
    %c0_0 = arith.constant 0 : index
    %0 = vector.load %arg1[%c0, %c0_0] : memref<16x64xbf16, #tpu.memory_space<vmem>>, vector<16x64xbf16>
    %c0_1 = arith.constant 0 : index
    %c0_2 = arith.constant 0 : index
    %1 = vector.load %arg2[%c0_1, %c0_2] : memref<64x128xbf16, #tpu.memory_space<vmem>>, vector<64x128xbf16>
    %cst = arith.constant dense<0.000000e+00> : vector<16x128xf32>
    %2 = tpu.matmul %0, %1, %cst {dimension_numbers = #tpu.dot_dimension_numbers<[1], [0], [0], [1], [0, 0, 1, 1], [], []>} : vector<16x64xbf16>, vector<64x128xbf16>, vector<16x128xf32> -> vector<16x128xf32>
    %c0_3 = arith.constant 0 : index
    %c0_4 = arith.constant 0 : index
    %3 = vector.load %arg3[%c0_3, %c0_4] : memref<2x128xf32, #tpu.memory_space<vmem>>, vector<1x128xf32>
    %4 = vector.broadcast %3 : vector<1x128xf32> to vector<16x128xf32>
    %5 = arith.addf %2, %4 : vector<16x128xf32>
    %cst_5 = arith.constant 0.000000e+00 : f32
    %6 = vector.broadcast %cst_5 : f32 to vector<16x128xf32>
    %7 = arith.maximumf %5, %6 : vector<16x128xf32>
    %8 = arith.truncf %7 : vector<16x128xf32> to vector<16x128xbf16>
    %c0_6 = arith.constant 0 : index
    %c0_7 = arith.constant 0 : index
    %9 = vector.load %arg4[%c0_6, %c0_7] : memref<128x128xbf16, #tpu.memory_space<vmem>>, vector<128x128xbf16>
    %cst_8 = arith.constant dense<0.000000e+00> : vector<16x128xf32>
    %10 = tpu.matmul %8, %9, %cst_8 {dimension_numbers = #tpu.dot_dimension_numbers<[1], [0], [0], [1], [0, 0, 1, 1], [], []>} : vector<16x128xbf16>, vector<128x128xbf16>, vector<16x128xf32> -> vector<16x128xf32>
    %c1 = arith.constant 1 : index
    %c0_9 = arith.constant 0 : index
    %11 = vector.load %arg3[%c1, %c0_9] : memref<2x128xf32, #tpu.memory_space<vmem>>, vector<1x128xf32>
    %12 = vector.broadcast %11 : vector<1x128xf32> to vector<16x128xf32>
    %13 = arith.addf %10, %12 : vector<16x128xf32>
    %cst_10 = arith.constant 0.000000e+00 : f32
    %14 = vector.broadcast %cst_10 : f32 to vector<16x128xf32>
    %15 = arith.maximumf %13, %14 : vector<16x128xf32>
    %16 = arith.truncf %15 : vector<16x128xf32> to vector<16x128xbf16>
    %c0_11 = arith.constant 0 : index
    %c0_12 = arith.constant 0 : index
    %17 = vector.load %arg5[%c0_11, %c0_12] : memref<128x128xbf16, #tpu.memory_space<vmem>>, vector<128x128xbf16>
    %cst_13 = arith.constant dense<0.000000e+00> : vector<16x128xf32>
    %18 = tpu.matmul %16, %17, %cst_13 {dimension_numbers = #tpu.dot_dimension_numbers<[1], [0], [0], [1], [0, 0, 1, 1], [], []>} : vector<16x128xbf16>, vector<128x128xbf16>, vector<16x128xf32> -> vector<16x128xf32>
    %c0_14 = arith.constant 0 : index
    %c0_15 = arith.constant 0 : index
    %19 = vector.load %arg6[%c0_14, %c0_15] : memref<16x256xf32, #tpu.memory_space<vmem>>, vector<16x128xf32>
    tpu.vector_store %arg6[%c0_14, %c0_15], %15 {strides = array<i32>} : memref<16x256xf32, #tpu.memory_space<vmem>>, vector<16x128xf32>,
    %c0_16 = arith.constant 0 : index
    %c128 = arith.constant 128 : index
    %20 = vector.load %arg6[%c0_16, %c128] : memref<16x256xf32, #tpu.memory_space<vmem>>, vector<16x128xf32>
    tpu.vector_store %arg6[%c0_16, %c128], %18 {strides = array<i32>} : memref<16x256xf32, #tpu.memory_space<vmem>>, vector<16x128xf32>,
    return
  }
  func.func @transform_0(%arg0: i32) -> (i32, i32) {
    %c0_i32 = arith.constant 0 : i32
    %c0_i32_0 = arith.constant 0 : i32
    return %arg0, %c0_i32 : i32, i32
  }
  func.func @transform_1(%arg0: i32) -> (i32, i32) {
    %c0_i32 = arith.constant 0 : i32
    %c0_i32_0 = arith.constant 0 : i32
    %c0_i32_1 = arith.constant 0 : i32
    return %c0_i32, %c0_i32_0 : i32, i32
  }
  func.func @transform_2(%arg0: i32) -> (i32, i32) {
    %c0_i32 = arith.constant 0 : i32
    %c0_i32_0 = arith.constant 0 : i32
    %c0_i32_1 = arith.constant 0 : i32
    return %c0_i32, %c0_i32_0 : i32, i32
  }
  func.func @transform_3(%arg0: i32) -> (i32, i32) {
    %c0_i32 = arith.constant 0 : i32
    %c0_i32_0 = arith.constant 0 : i32
    %c0_i32_1 = arith.constant 0 : i32
    return %c0_i32, %c0_i32_0 : i32, i32
  }
  func.func @transform_4(%arg0: i32) -> (i32, i32) {
    %c0_i32 = arith.constant 0 : i32
    %c0_i32_0 = arith.constant 0 : i32
    %c0_i32_1 = arith.constant 0 : i32
    return %c0_i32, %c0_i32_0 : i32, i32
  }
  func.func @transform_5(%arg0: i32) -> (i32, i32) {
    %c0_i32 = arith.constant 0 : i32
    %c0_i32_0 = arith.constant 0 : i32
    return %arg0, %c0_i32 : i32, i32
  }
}

</mosaic_0001>

<bundles_post_ra>
// kernel: tpu_custom_call.1
= control target key start
LH: loop header
LB: loop body
LE: loop exit
PB: predicated region body
PF: predicated region fallthrough
CT: control target
= control target key end

     0   :  { %10 = vsyncpa [#allocation3], 0  ;;  %s674_s0 = inlined_call_operand.hbm [shape: bf16[16,64], index: 0, kind: input, shape index: {}]   ;;  %s675_s1 = inlined_call_operand.hbm [shape: bf16[64,128], index: 1, kind: input, shape index: {}]   ;;  %s676_s2 = inlined_call_operand.hbm [shape: f32[2,128], index: 2, kind: input, shape index: {}]   ;;  %s677_s3 = inlined_call_operand.hbm [shape: bf16[128,128], index: 3, kind: input, shape index: {}]   ;;  %s678_s4 = inlined_call_operand.hbm [shape: bf16[128,128], index: 4, kind: input, shape index: {}]   ;;  %s679_s5 = inlined_call_operand.hbm [shape: f32[16,256], index: 5, kind: output, shape index: {}]  }
   0x1   :  { %11 = vsyncpa [#allocation6], 0 }
   0x2   :  { %12 = vsyncpa [#allocation9], 0 }
   0x3   :  { %13 = vsyncpa [#allocation4], 0  ;;  %s31_s20 = sshll.u32 %s675_s1, 4  ;;  %s616_s21 = smov [#allocation5]   ;;  %s32_s20 = int_to_ptr.hbm [resolvable:$true] %s31_s20 }
   0x4   :  { %s33_s22 = sshll.u32 %s616_s21, 4  ;;  %s55_s25 = sshll.u32 %s677_s3, 4  ;;  %s34_s22 = int_to_ptr.vmem [resolvable:$true] %s33_s22  ;;  %s56_s25 = int_to_ptr.hbm [resolvable:$true] %s55_s25 }
   0x5   :  { %s617_s26 = smov 64   ;;  %s618_s27 = smov 4  }
   0x6   :  { %39 = dma.hbm_to_vmem [thread:$0]  %s32_s20, 512, %s34_s22, [#allocation6], %s617_s26, %s617_s26, %s618_s27  }
   0x7   :  { %s619_s28 = smov [#allocation8]   ;;  %s18_s7 = sshll.u32 %s674_s0, 4  ;;  %s19_s7 = int_to_ptr.hbm [resolvable:$true] %s18_s7 }
   0x8   :  { %s57_s29 = sshll.u32 %s619_s28, 4  ;;  %s45_s9 = sshll.u32 %s676_s2, 4  ;;  %s58_s29 = int_to_ptr.vmem [resolvable:$true] %s57_s29  ;;  %s46_s9 = int_to_ptr.hbm [resolvable:$true] %s45_s9 }
   0x9   :  { %63 = dma.hbm_to_vmem [thread:$0]  %s56_s25, 1024, %s58_s29, [#allocation9], %s617_s26, %s617_s26, %s618_s27  }
   0xa   :  { %s620_s10 = smov [#allocation2]   ;;  %s621_s3 = smov [#allocation7]  }
   0xb   :  { %s20_s11 = sshll.u32 %s620_s10, 4  ;;  %s47_s12 = sshll.u32 %s621_s3, 4  ;;  %s21_s11 = int_to_ptr.vmem [resolvable:$true] %s20_s11  ;;  %s48_s12 = int_to_ptr.vmem [resolvable:$true] %s47_s12 }
   0xc   :  { %26 = dma.hbm_to_vmem [thread:$0]  %s19_s7, 128, %s21_s11, [#allocation3], %s617_s26, %s617_s26, %s618_s27  }
   0xd   :  { %s68_s15 = sshll.u32 %s678_s4, 4  ;;  %s622_s0 = smov [#allocation10]   ;;  %s69_s15 = int_to_ptr.hbm [resolvable:$true] %s68_s15 }
   0xe   :  { %50 = dma.hbm_to_vmem [thread:$0]  %s46_s9, 32, %s48_s12, [#allocation6]  }
   0xf   :  { %s70_s16 = sshll.u32 %s622_s0, 4  ;;  %s71_s16 = int_to_ptr.vmem [resolvable:$true] %s70_s16 }
  0x10   :  { %76 = dma.hbm_to_vmem [thread:$0]  %s69_s15, 1024, %s71_s16, [#allocation9], %s617_s26, %s617_s26, %s618_s27  }
  0x11   :  { %608 = dma.done.wait [#allocation3], 128  }
  0x12   :  { %609 = vsyncadd [#allocation3], 4294967168 }
  0x13   :  { %610 = dma.done.wait [#allocation6], 544  }
  0x14   :  { %611 = vsyncadd [#allocation6], 4294966752 }
  0x15   :  { %612 = dma.done.wait [#allocation9], 2048  }
  0x16   :  { %613 = vsyncadd [#allocation9], 4294965248  ;;  %v435_v0 = vld [vmem:[#allocation5 + $0x18] sm:$0xff]  ;;  %v434_v2 = vld [vmem:[#allocation5 + $0x10] sm:$0xff]  ;;  %vm139_vm0 = vcmask 523264   ;;  %s623_s2 = smov [#allocation11]  }
  0x17   :  { %v443_v1 = vld [vmem:[#allocation8 + $0x38] sm:$0xff]  ;;  %147 = vmatpush.bf16.msra.mxu0 %v435_v0  ;;  %v442_v3 = vld [vmem:[#allocation8 + $0x30] sm:$0xff]  ;;  %v433_v4 = vld [vmem:[#allocation5 + $0x8] sm:$0xff]  ;;  %s329_s4 = sshll.u32 %s623_s2, 4  ;;  %s331_s19 = sshll.u32 %s679_s5, 4  ;;  %s330_s4 = int_to_ptr.vmem [resolvable:$true] %s329_s4  ;;  %s332_s19 = int_to_ptr.hbm [resolvable:$true] %s331_s19 }
  0x18   :  { %226 = vmatpush.bf16.msra.mxu1 %v443_v1  ;;  %v441_v5 = vld [vmem:[#allocation8 + $0x28] sm:$0xff]  ;;  %v432_v6 = vld [vmem:[#allocation5] sm:$0xff]  ;;  %v431_v8 = vld [vmem:[#allocation2] sm:$0xff]  ;;  %s624_s20 = smov 256   ;;  %s625_s21 = smov 16  }
  0x19   :  { %v440_v7 = vld [vmem:[#allocation8 + $0x20] sm:$0xff]  ;;  %v439_v9 = vld [vmem:[#allocation8 + $0x18] sm:$0xff]  ;;  %v438_v10 = vld [vmem:[#allocation8 + $0x10] sm:$0xff] }
  0x1a   :  { %v437_v11 = vld [vmem:[#allocation8 + $0x8] sm:$0xff]  ;;  %v436_v12 = vld [vmem:[#allocation8] sm:$0xff]  ;;  %v451_v13 = vld [vmem:[#allocation10 + $0x38] sm:$0xff] }
  0x1b   :  { %148 = vmatpush.bf16.msra.mxu0 %v434_v2  ;;  %307 = vmatpush.bf16.msra.mxu2 %v451_v13  ;;  %v450_v14 = vld [vmem:[#allocation10 + $0x30] sm:$0xff]  ;;  %v449_v15 = vld [vmem:[#allocation10 + $0x28] sm:$0xff]  ;;  %v448_v16 = vld [vmem:[#allocation10 + $0x20] sm:$0xff] }
  0x1c   :  { %227 = vmatpush.bf16.msra.mxu1 %v442_v3  ;;  %v462_v18 = vld [vmem:[#allocation7] ss:$0 sm:$0xff]  ;;  %v446_v26 = vld [vmem:[#allocation10 + $0x10] sm:$0xff]  ;;  %v445_v27 = vld [vmem:[#allocation10 + $0x8] sm:$0xff] }
  0x1d   :  { %v447_v25 = vld [vmem:[#allocation10 + $0x18] sm:$0xff]  ;;  %v444_v28 = vld [vmem:[#allocation10] sm:$0xff] }
  0x1e   :  { %v463_v29 = vld [vmem:[#allocation7 + $0x1] ss:$0 sm:$0xff] }
  0x1f   :  { %149 = vmatpush.bf16.msra.mxu0 %v433_v4  ;;  %308 = vmatpush.bf16.msra.mxu2 %v450_v14 }
  0x20   :  { %228 = vmatpush.bf16.msra.mxu1 %v441_v5 }
  0x23   :  { %150 = vmatpush.bf16.msra.mxu0 %v432_v6  ;;  %309 = vmatpush.bf16.msra.mxu2 %v449_v15 }
  0x24   :  { %229 = vmatpush.bf16.msra.mxu1 %v440_v7 }
  0x26   :  { %366 = vmatmul.msk.bf16.vlgmr.msra.gmra.mxu0 %vm139_vm0, %v431_v8 }
  0x27   :  { %310 = vmatpush.bf16.msra.mxu2 %v448_v16 }
  0x28   :  { %230 = vmatpush.bf16.msra.mxu1 %v439_v9 }
  0x2b   :  { %311 = vmatpush.bf16.msra.mxu2 %v447_v25 }
  0x2c   :  { %231 = vmatpush.bf16.msra.mxu1 %v438_v10 }
  0x2f   :  { %312 = vmatpush.bf16.msra.mxu2 %v446_v26 }
  0x30   :  { %232 = vmatpush.bf16.msra.mxu1 %v437_v11 }
  0x33   :  { %313 = vmatpush.bf16.msra.mxu2 %v445_v27 }
  0x34   :  { %233 = vmatpush.bf16.msra.mxu1 %v436_v12 }
  0x37   :  { %314 = vmatpush.bf16.msra.mxu2 %v444_v28 }
  0xa3   :  { %v152_v17 = vpop.f32.mrf.mxu0 }
  0xa4   :  { %v153_v19 = vadd.f32 %v462_v18, %v152_v17 }
  0xa6   :  { %v157_v22 = vmax.f32 %v153_v19, 0.0 }
  0xab   :  { %v154_v20 = vpop.f32.mrf.mxu0 }
  0xac   :  { %v155_v21 = vadd.f32 %v462_v18, %v154_v20 }
  0xae   :  { %v158_v23 = vmax.f32 %v155_v21, 0.0 }
  0xb0   :  { %v159_v24 = vpack.c.bf16 %v158_v23, %v157_v22 }
  0xb2   :  { %234 = vmatmul.bf16.vlgmr.msra.gmra.mxu1 %v159_v24 }
 0x12f   :  { %v235_v30 = vpop.f32.mrf.mxu1 }
 0x130   :  { %v236_v31 = vadd.f32 %v463_v29, %v235_v30 }
 0x132   :  { %v240_v32 = vmax.f32 %v236_v31, 0.0 }
 0x134   :  { %321 = vst [vmem:[#allocation11] sm:$0xff] %v240_v32 }
 0x137   :  { %v237_v33 = vpop.f32.mrf.mxu1 }
 0x138   :  { %v238_v34 = vadd.f32 %v463_v29, %v237_v33 }
 0x13a   :  { %v241_v35 = vmax.f32 %v238_v34, 0.0 }
 0x13c   :  { %322 = vst [vmem:[#allocation11 + $0x10] sm:$0xff] %v241_v35  ;;  %v242_v36 = vpack.c.bf16 %v241_v35, %v240_v32 }
 0x13e   :  { %315 = vmatmul.bf16.vlgmr.msra.gmra.mxu2 %v242_v36 }
 0x1c1   :  { %v316_v37 = vpop.f32.mrf.mxu2 }
 0x1c2   :  { %323 = vst [vmem:[#allocation11 + $0x8] sm:$0xff] %v316_v37 }
 0x1c9   :  { %v318_v38 = vpop.f32.mrf.mxu2 }
 0x1ca   :  { %324 = vst [vmem:[#allocation11 + $0x18] sm:$0xff] %v318_v38 }
 0x1cb   :  { %337 = dma.vmem_to_hbm [thread:$0]  %s330_s4, 512, %s332_s19, [#allocation4], %s624_s20, %s624_s20, %s625_s21  }
 0x1cc   :  { %614 = dma.done.wait [#allocation4], 512  }
 0x1cd   :  { %615 = vsyncadd [#allocation4], 4294966784 }
 0x1ce   :  { %342 = vsyncpa [#allocation3], 1 }
 0x1cf   :  { %343 = vsyncpa [#allocation6], 1 }
 0x1d0   :  { %344 = vsyncpa [#allocation9], 1 }
 0x1d1   :  { %345 = vsyncpa [#allocation4], 1 }

</bundles_post_ra>
